<compile_context>
chip_gen: v7x
topology: tpu7x:2x2x1
jax: 0.10.0
libtpu: 0.0.40
codegen_flags: <defaults>
</compile_context>

<pallas_src>
import functools
import math

import jax
import jax.numpy as jnp
from jax.experimental import pallas as pl
from jax.experimental.pallas import tpu as pltpu

_LANE = 128
_SUBLANE = 8
_TARGET_STEPS = 8            # aim for >= this many grid steps (pipeline overlap)
_MIN_BLOCK_BYTES = 256 << 10  # don't shrink per-stream blocks below this for steps
_MIN_PALLAS_BYTES = 1 << 20   # below this, plain XLA fusion wins


def _round_up(x, m):
    return ((x + m - 1) // m) * m


def _cdiv(a, b):
    return -(-a // b)


def _tpu_block_defaults():
    """(per-stream block-byte cap, scoped vmem_limit_bytes) per TPU generation."""
    try:
        kind = jax.devices()[0].device_kind.lower()
    except Exception:
        kind = ""
    if "v5e" in kind or "v5 lite" in kind or "v5lite" in kind:
        # default scoped VMEM is only 16 MiB; lift it so the 4-stream DDPM
        # variant keeps 2 MiB/stream double-buffered blocks.
        return 2 << 20, 32 << 20
    if "v6" in kind:
        # 1.4 TB/s HBM, 128 MiB physical VMEM: 4 MiB blocks -> ~3% step overhead.
        return 4 << 20, 64 << 20
    if "v7" in kind or "tpu7" in kind:
        # 3.2 TB/s HBM, 64 MiB physical VMEM: 4 MiB blocks, leave scratch headroom.
        return 4 << 20, 48 << 20
    # Unknown generation (v4/v5p/interpret): conservative but still large.
    return 2 << 20, 32 << 20


# ----------------------------------------------------------------------------
# Noise schedule (buffer setup — plain JAX, deterministic).
# ----------------------------------------------------------------------------
def linear_noise_schedule(beta_1: float, beta_T: float, steps: int, scale: float):
    total_steps = int(steps * scale)
    beta = jnp.linspace(beta_1, beta_T, total_steps, dtype=jnp.float32) / scale
    alpha = 1.0 - beta
    alpha_bar = jnp.cumprod(alpha, axis=0)
    return beta, alpha, alpha_bar


# ----------------------------------------------------------------------------
# Shared kernel: out = clip?( sum_i coef[:, i] * x_i , -1, 1 )
# ----------------------------------------------------------------------------
def _lincomb_kernel(coef_ref, *refs, n_terms, clip):
    data_refs = refs[:n_terms]
    out_ref = refs[n_terms]
    coef = coef_ref[...]  # (tb, 1, n) or (tb, n) f32 — broadcasts over the tile
    acc = coef[..., 0:1] * data_refs[0][...].astype(jnp.float32)
    for i in range(1, n_terms):
        acc = acc + coef[..., i:i + 1] * data_refs[i][...].astype(jnp.float32)
    if clip:
        acc = jnp.clip(acc, -1.0, 1.0)
    out_ref[...] = acc.astype(out_ref.dtype)


# ----------------------------------------------------------------------------
# Tile choosers (cdiv grids — tiles need not divide the extents).
# ----------------------------------------------------------------------------
def _choose_tiles_3d(B, R, itemsize, cap_bytes):
    """Data block (tb, tr, 128) for the lane-aligned [B, R, 128] slab."""
    bytes_per_row = _LANE * itemsize
    cap_rows = max(_SUBLANE, (cap_bytes // bytes_per_row) // _SUBLANE * _SUBLANE)
    R8 = _round_up(R, _SUBLANE)
    tr = min(R8, cap_rows)
    tb = 1
    if R8 <= cap_rows:
        tb = max(1, min(B, cap_bytes // (R8 * bytes_per_row)))
    # Guarantee enough grid steps for DMA/compute overlap and an even megacore
    # split, as long as blocks stay comfortably sized.
    while _cdiv(B, tb) * _cdiv(R, tr) < _TARGET_STEPS:
        if tb * min(tr, R8) * bytes_per_row <= _MIN_BLOCK_BYTES:
            break
        if tb > 1:
            tb = _cdiv(tb, 2)
        elif tr > _SUBLANE:
            tr = max(_SUBLANE, _round_up(tr // 2, _SUBLANE))
        else:
            break
    if tr >= R:
        tr = R  # full-extent row block (legal even when R % 8 != 0)
    return tb, tr


def _choose_tiles_2d(B, chw, itemsize, cap_bytes):
    """Data block (tb, tc) for the flat [B, chw] layout (chw not lane-aligned)."""
    tb = B if B <= _SUBLANE else _SUBLANE  # multiple of 8 or full B
    # VMEM tiles are (8, 128): a tb < 8 block still occupies 8 sublanes.
    bytes_per_lane_col = _round_up(tb, _SUBLANE) * _LANE * itemsize
    cap_cols = max(1, cap_bytes // bytes_per_lane_col)
    tc = min(_round_up(chw, _LANE), cap_cols * _LANE)
    while _cdiv(B, tb) * _cdiv(chw, tc) < _TARGET_STEPS:
        if _round_up(tb, _SUBLANE) * tc * itemsize <= _MIN_BLOCK_BYTES or tc <= _LANE:
            break
        tc = max(_LANE, _round_up(tc // 2, _LANE))
    if tc >= chw:
        tc = chw  # full-extent block (legal even when chw % 128 != 0)
    return tb, tc


# ----------------------------------------------------------------------------
# Batched per-sample linear combination.
# ----------------------------------------------------------------------------
def _batched_lincomb(coeffs, tensors, clip, out_dtype=None,
                     block_cap_bytes=None, vmem_limit_bytes=None):
    """out[b] = (clip to [-1,1])( sum_i coeffs[i][b] * tensors[i][b] )."""
    n = len(tensors)
    assert len(coeffs) == n and n >= 1
    shape = tensors[0].shape
    for x in tensors[1:]:
        assert x.shape == shape
    B = shape[0]
    chw = math.prod(shape[1:]) if len(shape) > 1 else 1
    out_dtype = out_dtype or tensors[0].dtype
    itemsize = jnp.dtype(tensors[0].dtype).itemsize

    cap_default, vmem_default = _tpu_block_defaults()
    cap = block_cap_bytes or cap_default
    vmem_limit = vmem_limit_bytes or vmem_default

    # Per-sample scalar coefficients, folded in the wrapper and shipped to the
    # kernel as ONE tiny f32 block per grid step (single extra VMEM stream).
    coef = jnp.stack([c.astype(jnp.float32).reshape(B) for c in coeffs], axis=-1)

    if chw % _LANE == 0:
        # Lane-aligned fast path: pure-metadata reshape to a [B, R, 128] slab,
        # every load/store is a dense vld/vst.  No padding, no output slicing.
        R = chw // _LANE
        flats = [x.reshape(B, R, _LANE) for x in tensors]
        tb, tr = _choose_tiles_3d(B, R, itemsize, cap)
        grid = (_cdiv(B, tb), _cdiv(R, tr))
        data_spec = pl.BlockSpec((tb, tr, _LANE), lambda i, j: (i, j, 0))
        coef_arr = coef.reshape(B, 1, n)
        coef_spec = pl.BlockSpec((tb, 1, n), lambda i, j: (i, 0, 0))
        out_shape = jax.ShapeDtypeStruct((B, R, _LANE), out_dtype)
    else:
        # Ragged tail: keep the flat [B, chw] layout.  Boundary blocks are
        # masked by Pallas (OOB reads feed OOB writes which are discarded), so
        # there is still no jnp.pad and no output slice.
        flats = [x.reshape(B, chw) for x in tensors]
        tb, tc = _choose_tiles_2d(B, chw, itemsize, cap)
        grid = (_cdiv(B, tb), _cdiv(chw, tc))
        data_spec = pl.BlockSpec((tb, tc), lambda i, j: (i, j))
        coef_arr = coef
        coef_spec = pl.BlockSpec((tb, n), lambda i, j: (i, 0))
        out_shape = jax.ShapeDtypeStruct((B, chw), out_dtype)

    cost = pl.CostEstimate(
        flops=int(2 * n * B * chw),
        transcendentals=0,
        bytes_accessed=int((n * itemsize + jnp.dtype(out_dtype).itemsize) * B * chw
                           + coef.size * 4))

    out = pl.pallas_call(
        functools.partial(_lincomb_kernel, n_terms=n, clip=clip),
        out_shape=out_shape,
        grid=grid,
        in_specs=[coef_spec] + [data_spec] * n,
        out_specs=data_spec,
        compiler_params=pltpu.CompilerParams(
            dimension_semantics=("parallel", "parallel"),
            vmem_limit_bytes=vmem_limit),
        cost_estimate=cost,
    )(coef_arr, *flats)
    # TODO(synk): when the caller donates x_t (sampling loop) the first data
    # input could be aliased to the output via input_output_aliases to halve
    # per-step HBM allocation; left off to keep the public API non-donating.
    return out.reshape(shape)


def _bcast(c, ndim):
    return c.reshape((-1,) + (1,) * (ndim - 1))


def _should_use_pallas(x, use_pallas):
    if use_pallas is not None:
        return use_pallas
    return x.size * jnp.dtype(x.dtype).itemsize >= _MIN_PALLAS_BYTES


# ----------------------------------------------------------------------------
# Plain-JAX references (also the small-tensor fallback path).
# Output dtype matches the input dtype, same as the Pallas path.
# ----------------------------------------------------------------------------
def sample_q_ref(x_0, eps, t, alpha_bar):
    ab = _bcast(alpha_bar[t], x_0.ndim)
    x = jnp.sqrt(ab) * x_0 + jnp.sqrt(1.0 - ab) * eps
    return x.astype(x_0.dtype)


def remove_noise_ddim_ref(x_t, eps_pred, t, t_next, alpha_bar):
    factor = jnp.sqrt(1.0 - alpha_bar)
    ab_t = _bcast(alpha_bar[t], x_t.ndim)
    f_t = _bcast(factor[t], x_t.ndim)
    ab_n = _bcast(alpha_bar[t_next], x_t.ndim)
    f_n = _bcast(factor[t_next], x_t.ndim)
    x0_hat = (x_t - f_t * eps_pred) / jnp.sqrt(ab_t)
    x = jnp.sqrt(ab_n) * x0_hat + f_n * eps_pred
    return jnp.clip(x, -1.0, 1.0).astype(x_t.dtype)


def remove_noise_ddpm_ref(x_t, eps_pred, t, z, beta, alpha, alpha_bar):
    factor = jnp.sqrt(1.0 - alpha_bar)
    a_t = _bcast(alpha[t], x_t.ndim)
    f_t = _bcast(factor[t], x_t.ndim)
    sig = _bcast(jnp.sqrt(beta[t]), x_t.ndim)
    mask = _bcast((t > 0).astype(jnp.float32), x_t.ndim)
    x = 1.0 / jnp.sqrt(a_t) * (x_t - (1.0 - a_t) / f_t * eps_pred)
    x = x + sig * mask * z
    return jnp.clip(x, -1.0, 1.0).astype(x_t.dtype)


# ----------------------------------------------------------------------------
# Public ops (Pallas path with auto-dispatch to fused XLA for tiny tensors).
# ----------------------------------------------------------------------------
def sample_q(x_0, eps, t, alpha_bar, *, use_pallas=None):
    """x_t = sqrt(ab[t]) * x_0 + sqrt(1 - ab[t]) * eps."""
    if not _should_use_pallas(x_0, use_pallas):
        return sample_q_ref(x_0, eps, t, alpha_bar)
    ab = alpha_bar[t]
    return _batched_lincomb([jnp.sqrt(ab), jnp.sqrt(1.0 - ab)], [x_0, eps],
                            clip=False)


def remove_noise_ddim(x_t, eps_pred, t, t_next, alpha_bar, *, use_pallas=None):
    """DDIM step, folded to clip(a*x_t + b*eps_pred, -1, 1)."""
    if not _should_use_pallas(x_t, use_pallas):
        return remove_noise_ddim_ref(x_t, eps_pred, t, t_next, alpha_bar)
    ab_t = alpha_bar[t]
    ab_n = alpha_bar[t_next]
    # Exact algebraic refactor of the reference DDIM math into two per-sample
    # scalars; sqrt of the ratio (rather than sqrt/sqrt) reduces blow-up when
    # alpha_bar underflows on very long schedules.
    a = jnp.sqrt(ab_n / ab_t)
    b = jnp.sqrt(1.0 - ab_n) - a * jnp.sqrt(1.0 - ab_t)
    return _batched_lincomb([a, b], [x_t, eps_pred], clip=True)


def remove_noise_ddpm(x_t, eps_pred, t, z, beta, alpha, alpha_bar, *, use_pallas=None):
    """DDPM step, folded to clip(a*x_t + b*eps_pred + c*z, -1, 1).

    `z` is the caller-supplied standard-normal noise (torch.randn_like in the
    reference); the (t > 0) gating is folded into the coefficient c.
    """
    if not _should_use_pallas(x_t, use_pallas):
        return remove_noise_ddpm_ref(x_t, eps_pred, t, z, beta, alpha, alpha_bar)
    a_t = alpha[t]
    ab_t = alpha_bar[t]
    a = 1.0 / jnp.sqrt(a_t)
    b = -a * (1.0 - a_t) / jnp.sqrt(1.0 - ab_t)
    c = jnp.sqrt(beta[t]) * (t > 0).astype(jnp.float32)
    return _batched_lincomb([a, b, c], [x_t, eps_pred, z], clip=True)


if __name__ == "__main__":
    # Small shapes consistent with the module's NCHW image inputs.
    B, C, H, W = 2, 4, 16, 16
    beta, alpha, alpha_bar = linear_noise_schedule(
        beta_1=1e-4, beta_T=0.02, steps=8, scale=1.0)
    T = alpha_bar.shape[0]

    key = jax.random.PRNGKey(0)
    (k_x0, k_eps, k_t, k_pred, k_z,
     k_b1, k_b2, k_c1, k_c2) = jax.random.split(key, 9)
    x_0 = jax.random.normal(k_x0, (B, C, H, W), dtype=jnp.float32)
    eps = jax.random.normal(k_eps, (B, C, H, W), dtype=jnp.float32)
    t = jax.random.randint(k_t, (B,), 1, T, dtype=jnp.int32)
    t_next = jnp.maximum(t - 1, 0).astype(jnp.int32)
    eps_pred = jax.random.normal(k_pred, (B, C, H, W), dtype=jnp.float32)
    z = jax.random.normal(k_z, (B, C, H, W), dtype=jnp.float32)

    # use_pallas=True: at these toy shapes the auto-dispatch would (correctly)
    # pick the fused-XLA path; force the Pallas kernels so they are exercised.
    x_t = jax.block_until_ready(sample_q(x_0, eps, t, alpha_bar, use_pallas=True))
    assert jnp.allclose(x_t, sample_q_ref(x_0, eps, t, alpha_bar),
                        atol=1e-5, rtol=1e-5), "sample_q mismatch"

    x_ddim = jax.block_until_ready(
        remove_noise_ddim(x_t, eps_pred, t, t_next, alpha_bar, use_pallas=True))
    assert jnp.allclose(x_ddim,
                        remove_noise_ddim_ref(x_t, eps_pred, t, t_next, alpha_bar),
                        atol=1e-5, rtol=1e-5), "ddim mismatch"

    x_ddpm = jax.block_until_ready(
        remove_noise_ddpm(x_t, eps_pred, t, z, beta, alpha, alpha_bar,
                          use_pallas=True))
    assert jnp.allclose(x_ddpm,
                        remove_noise_ddpm_ref(x_t, eps_pred, t, z, beta, alpha,
                                              alpha_bar),
                        atol=1e-5, rtol=1e-5), "ddpm mismatch"

    ab = alpha_bar[t]
    coeffs = [jnp.sqrt(ab), jnp.sqrt(1.0 - ab)]

    # Exercise the cdiv/masked-boundary row tiling: R = 21 rows, 8-row blocks.
    xb = jax.random.normal(k_b1, (B, 3, 7, 128), dtype=jnp.float32)
    eb = jax.random.normal(k_b2, (B, 3, 7, 128), dtype=jnp.float32)
    got = jax.block_until_ready(_batched_lincomb(
        coeffs, [xb, eb], clip=False, block_cap_bytes=_SUBLANE * _LANE * 4))
    assert jnp.allclose(got, sample_q_ref(xb, eb, t, alpha_bar),
                        atol=1e-5, rtol=1e-5), "masked-row mismatch"

    # Exercise the non-lane-aligned flat [B, chw] path (chw = 588) with a
    # masked lane-boundary block.
    xc = jax.random.normal(k_c1, (B, 3, 14, 14), dtype=jnp.float32)
    ec = jax.random.normal(k_c2, (B, 3, 14, 14), dtype=jnp.float32)
    got = jax.block_until_ready(_batched_lincomb(
        coeffs, [xc, ec], clip=False, block_cap_bytes=2 * _SUBLANE * _LANE * 4))
    assert jnp.allclose(got, sample_q_ref(xc, ec, t, alpha_bar),
                        atol=1e-5, rtol=1e-5), "ragged-chw mismatch"

    print("KERNEL_OK")
</pallas_src>

<mosaic_0001>
module attributes {stable_mosaic.version = 11 : i64} {
  func.func @_lincomb_kernel(%arg0: i32, %arg1: i32, %arg2: memref<2x1x2xf32, #tpu.memory_space<vmem>>, %arg3: memref<2x8x128xf32, #tpu.memory_space<vmem>>, %arg4: memref<2x8x128xf32, #tpu.memory_space<vmem>>, %arg5: memref<2x8x128xf32, #tpu.memory_space<vmem>>) attributes {dimension_semantics = [#tpu.dimension_semantics<parallel>, #tpu.dimension_semantics<parallel>], iteration_bounds = array<i64: 1, 1>, scalar_prefetch = 0 : i64, scratch_operands = 0 : i64, tpu.core_type = #tpu.core_type<tc>, window_params = [{transform_indices = @transform_0, window_bounds = array<i64: 2, 1, 2>}, {transform_indices = @transform_1, window_bounds = array<i64: 2, 8, 128>}, {transform_indices = @transform_2, window_bounds = array<i64: 2, 8, 128>}, {transform_indices = @transform_3, window_bounds = array<i64: 2, 8, 128>}]} {
    %c0 = arith.constant 0 : index
    %c0_0 = arith.constant 0 : index
    %c0_1 = arith.constant 0 : index
    %0 = vector.load %arg2[%c0, %c0_0, %c0_1] : memref<2x1x2xf32, #tpu.memory_space<vmem>>, vector<2x1x2xf32>
    %1 = vector.extract_strided_slice %0 {offsets = [0, 0, 0], sizes = [2, 1, 1], strides = [1, 1, 1]} : vector<2x1x2xf32> to vector<2x1x1xf32>
    %c0_2 = arith.constant 0 : index
    %c0_3 = arith.constant 0 : index
    %c0_4 = arith.constant 0 : index
    %2 = vector.load %arg3[%c0_2, %c0_3, %c0_4] : memref<2x8x128xf32, #tpu.memory_space<vmem>>, vector<2x8x128xf32>
    %3 = vector.broadcast %1 : vector<2x1x1xf32> to vector<2x8x128xf32>
    %4 = arith.mulf %3, %2 : vector<2x8x128xf32>
    %5 = vector.extract_strided_slice %0 {offsets = [0, 0, 1], sizes = [2, 1, 1], strides = [1, 1, 1]} : vector<2x1x2xf32> to vector<2x1x1xf32>
    %c0_5 = arith.constant 0 : index
    %c0_6 = arith.constant 0 : index
    %c0_7 = arith.constant 0 : index
    %6 = vector.load %arg4[%c0_5, %c0_6, %c0_7] : memref<2x8x128xf32, #tpu.memory_space<vmem>>, vector<2x8x128xf32>
    %7 = vector.broadcast %5 : vector<2x1x1xf32> to vector<2x8x128xf32>
    %8 = arith.mulf %7, %6 : vector<2x8x128xf32>
    %9 = arith.addf %4, %8 : vector<2x8x128xf32>
    %c0_8 = arith.constant 0 : index
    %c0_9 = arith.constant 0 : index
    %c0_10 = arith.constant 0 : index
    %10 = vector.load %arg5[%c0_8, %c0_9, %c0_10] : memref<2x8x128xf32, #tpu.memory_space<vmem>>, vector<2x8x128xf32>
    tpu.vector_store %arg5[%c0_8, %c0_9, %c0_10], %9 {strides = array<i32>} : memref<2x8x128xf32, #tpu.memory_space<vmem>>, vector<2x8x128xf32>,
    return
  }
  func.func @transform_0(%arg0: i32, %arg1: i32) -> (i32, i32, i32) {
    %c0_i32 = arith.constant 0 : i32
    %c0_i32_0 = arith.constant 0 : i32
    %c0_i32_1 = arith.constant 0 : i32
    return %arg0, %c0_i32, %c0_i32_0 : i32, i32, i32
  }
  func.func @transform_1(%arg0: i32, %arg1: i32) -> (i32, i32, i32) {
    %c0_i32 = arith.constant 0 : i32
    %c0_i32_0 = arith.constant 0 : i32
    return %arg0, %arg1, %c0_i32 : i32, i32, i32
  }
  func.func @transform_2(%arg0: i32, %arg1: i32) -> (i32, i32, i32) {
    %c0_i32 = arith.constant 0 : i32
    %c0_i32_0 = arith.constant 0 : i32
    return %arg0, %arg1, %c0_i32 : i32, i32, i32
  }
  func.func @transform_3(%arg0: i32, %arg1: i32) -> (i32, i32, i32) {
    %c0_i32 = arith.constant 0 : i32
    %c0_i32_0 = arith.constant 0 : i32
    return %arg0, %arg1, %c0_i32 : i32, i32, i32
  }
}

</mosaic_0001>

<bundles_post_ra>
// kernel: tpu_custom_call.1
= control target key start
LH: loop header
LB: loop body
LE: loop exit
PB: predicated region body
PF: predicated region fallthrough
CT: control target
= control target key end

     0   :  { %8 = vsyncpa [#allocation3], 0  ;;  %s310_s0 = inlined_call_operand.hbm [shape: f32[2,1,2], index: 0, kind: input, shape index: {}]   ;;  %s311_s1 = inlined_call_operand.hbm [shape: f32[2,8,128], index: 1, kind: input, shape index: {}]   ;;  %s312_s2 = inlined_call_operand.hbm [shape: f32[2,8,128], index: 2, kind: input, shape index: {}]   ;;  %s313_s3 = inlined_call_operand.hbm [shape: f32[2,8,128], index: 3, kind: output, shape index: {}]  }
   0x1   :  { %9 = vsyncpa [#allocation6], 0 }
   0x2   :  { %10 = vsyncpa [#allocation4], 0  ;;  %s223_s12 = smov [#allocation5]   ;;  %s129_s16 = scalar_lea.hbm %s311_s1, 256 }
   0x3   :  { %s28_s13 = sshll.u32 %s223_s12, 4  ;;  %p130_p0 = scmp.ne.s32.totalorder %s311_s1, %s129_s16  ;;  %s29_s13 = int_to_ptr.vmem [resolvable:$true] %s28_s13 }
   0x4   :  { %p133_p1 = scmp.lt.u32.totalorder %s129_s16, %s311_s1 }
   0x6   :  { %p135_p2 = pnand %p133_p1, %p130_p0 }
   0x8   :  { %138 = shalt.err (!%p135_p2)
}
   0x9   :  { %s139_s21 = scalar_lea.vmem %s29_s13, 256  ;;  %p144_p4 = scmp.lt.s32.totalorder %s29_s13, %s29_s13 }
   0xa   :  { %p140_p3 = scmp.ne.s32.totalorder %s29_s13, %s139_s21  ;;  %p145_p5 = scmp.lt.s32.totalorder %s139_s21, %s139_s21 }
   0xc   :  { %p146_p6 = por %p145_p5, %p144_p4 }
   0xe   :  { %p147_p7 = pnand %p146_p6, %p140_p3 }
  0x10   :  { %150 = shalt.err (!%p147_p7)
}
  0x11   :  { %s224_s22 = smov 128   ;;  %s225_s23 = smov 8  }
  0x12   :  { %34 = dma.hbm_to_vmem [thread:$0]  %s311_s1, 256, %s29_s13, [#allocation6], %s224_s22, %s224_s22, %s225_s23  }
  0x13   :  { %s226_s26 = smov [#allocation2]   ;;  %s151_s30 = scalar_lea.hbm %s310_s0, 32 }
  0x14   :  { %s16_s27 = sshll.u32 %s226_s26, 4  ;;  %p152_p8 = scmp.ne.s32.totalorder %s310_s0, %s151_s30  ;;  %s17_s27 = int_to_ptr.vmem [resolvable:$true] %s16_s27 }
  0x15   :  { %p155_p9 = scmp.lt.u32.totalorder %s151_s30, %s310_s0 }
  0x17   :  { %p157_p10 = pnand %p155_p9, %p152_p8 }
  0x19   :  { %160 = shalt.err (!%p157_p10)
}
  0x1a   :  { %s161_s8 = scalar_lea.vmem %s17_s27, 32  ;;  %p166_p12 = scmp.lt.s32.totalorder %s17_s27, %s17_s27 }
  0x1b   :  { %p162_p11 = scmp.ne.s32.totalorder %s17_s27, %s161_s8  ;;  %p167_p13 = scmp.lt.s32.totalorder %s161_s8, %s161_s8 }
  0x1d   :  { %p168_p0 = por %p167_p13, %p166_p12 }
  0x1f   :  { %p169_p1 = pnand %p168_p0, %p162_p11 }
  0x21   :  { %172 = shalt.err (!%p169_p1)
}
  0x22   :  { %s227_s1 = smov 16   ;;  %s228_s9 = smov 1  }
  0x23   :  { %22 = dma.hbm_to_vmem [thread:$0]  %s310_s0, 32, %s17_s27, [#allocation3], %s227_s1, %s227_s1, %s228_s9  }
  0x24   :  { %s229_s12 = smov [#allocation7]   ;;  %s173_s16 = scalar_lea.hbm %s312_s2, 256 }
  0x25   :  { %s40_s13 = sshll.u32 %s229_s12, 4  ;;  %p174_p2 = scmp.ne.s32.totalorder %s312_s2, %s173_s16  ;;  %s41_s13 = int_to_ptr.vmem [resolvable:$true] %s40_s13 }
  0x26   :  { %p177_p3 = scmp.lt.u32.totalorder %s173_s16, %s312_s2 }
  0x28   :  { %p179_p4 = pnand %p177_p3, %p174_p2 }
  0x2a   :  { %182 = shalt.err (!%p179_p4)
}
  0x2b   :  { %s183_s21 = scalar_lea.vmem %s41_s13, 256  ;;  %p188_p6 = scmp.lt.s32.totalorder %s41_s13, %s41_s13 }
  0x2c   :  { %p184_p5 = scmp.ne.s32.totalorder %s41_s13, %s183_s21  ;;  %p189_p7 = scmp.lt.s32.totalorder %s183_s21, %s183_s21 }
  0x2e   :  { %p190_p8 = por %p189_p7, %p188_p6 }
  0x30   :  { %p191_p9 = pnand %p190_p8, %p184_p5 }
  0x32   :  { %194 = shalt.err (!%p191_p9)
}
  0x33   :  { %46 = dma.hbm_to_vmem [thread:$0]  %s312_s2, 256, %s41_s13, [#allocation6], %s224_s22, %s224_s22, %s225_s23  }
  0x34   :  { %217 = dma.done.wait [#allocation3], 32  }
  0x35   :  { %218 = vsyncadd [#allocation3], 4294967264 }
  0x36   :  { %219 = dma.done.wait [#allocation6], 512  }
  0x37   :  { %220 = vsyncadd [#allocation6], 4294966784  ;;  %v230_v0 = vmov 1   ;;  %v231_v1 = vmov 0   ;;  %v114_v2 = vld [vmem:[#allocation2] ss:$0 sm:$0xff] }
  0x38   :  { %127 = vset.pattern.permute.xlu1 %v230_v0  ;;  %126 = vset.pattern.permute.xlu0 %v231_v1  ;;  %v115_v3 = vld [vmem:[#allocation2 + $0x1] ss:$0 sm:$0xff]  ;;  %v80_v4 = vld [vmem:[#allocation7] sm:$0xff]  ;;  %v58_v5 = vld [vmem:[#allocation5] sm:$0xff]  ;;  %s232_s2 = smov [#allocation8]  }
  0x39   :  { %83 = vperm.xlu1 %127, %v114_v2   ;;  %71 = vperm.xlu0 %126, %v114_v2   ;;  %v81_v10 = vld [vmem:[#allocation7 + $0x8] sm:$0xff]  ;;  %v59_v11 = vld [vmem:[#allocation5 + $0x8] sm:$0xff]  ;;  %s101_s25 = sshll.u32 %s232_s2, 4  ;;  %s102_s25 = int_to_ptr.vmem [resolvable:$true] %s101_s25 }
  0x3a   :  { %s195_s26 = scalar_lea.vmem %s102_s25, 256  ;;  %p200_p11 = scmp.lt.s32.totalorder %s102_s25, %s102_s25 }
  0x3b   :  { %p196_p10 = scmp.ne.s32.totalorder %s102_s25, %s195_s26  ;;  %p201_p12 = scmp.lt.s32.totalorder %s195_s26, %s195_s26 }
  0x3d   :  { %87 = vperm.xlu1 %127, %v115_v3   ;;  %75 = vperm.xlu0 %126, %v115_v3   ;;  %p202_p13 = por %p201_p12, %p200_p11 }
  0x3f   :  { %p203_p0 = pnand %p202_p13, %p196_p10 }
  0x41   :  { %128 = vset.pattern.permute.xlu0 %v230_v0 }
  0xb8   :  { %v84_v6 = vpop.permute.xlu1 %83  ;;  %v72_v7 = vpop.permute.xlu0 %71 }
  0xb9   :  { %v90_v8 = vmul.f32 %v84_v6, %v80_v4  ;;  %v78_v9 = vmul.f32 %v72_v7, %v58_v5 }
  0xbb   :  { %v92_v12 = vadd.f32 %v90_v8, %v78_v9 }
  0xbc   :  { %v88_v13 = vpop.permute.xlu1 %87  ;;  %v76_v14 = vpop.permute.xlu0 %75 }
  0xbd   :  { %94 = vst [vmem:[#allocation8] sm:$0xff] %v92_v12  ;;  %v91_v15 = vmul.f32 %v88_v13, %v81_v10  ;;  %v79_v16 = vmul.f32 %v76_v14, %v59_v11 }
  0xbf   :  { %v93_v17 = vadd.f32 %v91_v15, %v79_v16 }
  0xc1   :  { %95 = vst [vmem:[#allocation8 + $0x8] sm:$0xff] %v93_v17 }
  0xc2   :  { %206 = shalt.err (!%p203_p0)
}
  0xc3   :  { %s207_s29 = scalar_lea.hbm %s313_s3, 256 }
  0xc4   :  { %p208_p1 = scmp.ne.s32.totalorder %s313_s3, %s207_s29  ;;  %p211_p2 = scmp.lt.u32.totalorder %s207_s29, %s313_s3 }
  0xc6   :  { %p213_p3 = pnand %p211_p2, %p208_p1 }
  0xc8   :  { %216 = shalt.err (!%p213_p3)
}
  0xc9   :  { %107 = dma.vmem_to_hbm [thread:$0]  %s102_s25, 256, %s313_s3, [#allocation4], %s224_s22, %s224_s22, %s225_s23  }
  0xca   :  { %221 = dma.done.wait [#allocation4], 256  }
  0xcb   :  { %222 = vsyncadd [#allocation4], 4294967040 }
  0xcc   :  { %111 = vsyncpa [#allocation3], 1 }
  0xcd   :  { %112 = vsyncpa [#allocation6], 1 }
  0xce   :  { %113 = vsyncpa [#allocation4], 1 }

</bundles_post_ra>
